<compile_context>
chip_gen: v7x
topology: tpu7x:2x2x1
jax: 0.10.0
libtpu: 0.0.40
codegen_flags: <defaults>
</compile_context>

<pallas_src>
import jax
import jax.numpy as jnp
from jax.experimental import pallas as pl
from jax.experimental.pallas import tpu as pltpu

HIDDEN = 10
LANES = 128
SUBLANES = 8
BLOCK = SUBLANES * LANES            # 1024: one full f32 vreg of activations
N_PARAMS = 3 * HIDDEN + 1           # w1(10) + b1(10) + w2(10) + b2(1) = 31


def agent_mlp_kernel(params_ref, x_ref, o_ref):
    """params_ref: SMEM f32[31] = [w1(10), b1(10), w2(10), b2(1)].
    x_ref / o_ref: VMEM f32[rows, 128] lane-dense activations (rows % 8 == 0)."""
    x = x_ref[...]                                  # (rows, 128) f32, full vregs

    # Per-hidden-unit terms: w2[j] * tanh(w1[j] * x + b1[j])
    #   VPU broadcast-FMA + EUP tanh per term (EUP is the binding slot; fixed
    #   by the model at N*HIDDEN tanh pushes).
    terms = [
        params_ref[2 * HIDDEN + j]
        * jnp.tanh(params_ref[j] * x + params_ref[HIDDEN + j])
        for j in range(HIDDEN)
    ]

    # Balanced tree-sum (serial dep chain ~log2(10) ~= 4 adds instead of 10).
    while len(terms) > 1:
        nxt = [terms[i] + terms[i + 1] for i in range(0, len(terms) - 1, 2)]
        if len(terms) % 2:
            nxt.append(terms[-1])
        terms = nxt

    o_ref[...] = terms[0] + params_ref[3 * HIDDEN]  # + b2


def pack_params(w1, b1, w2, b2):
    """Pack all 31 parameters into one f32 vector.  Do this ONCE at init /
    after each optimizer step, not per forward call."""
    return jnp.concatenate(
        [w1.reshape(-1), b1.reshape(-1), w2.reshape(-1), b2.reshape(-1)]
    ).astype(jnp.float32)


@jax.jit
def agent_forward(x, params):
    """x: (N, 1) float32, params: f32[31] (from pack_params) -> (N, 1) float32."""
    n = x.shape[0]
    n_pad = ((n + BLOCK - 1) // BLOCK) * BLOCK      # pad to whole 8x128 vregs
    rows = n_pad // LANES

    # Lane-dense, sublane-full input view (pad/reshape fuse under jit).
    x_flat = jnp.pad(x.reshape(-1), (0, n_pad - n))
    x_2d = x_flat.reshape(rows, LANES)

    cost = pl.CostEstimate(
        flops=4 * n_pad * HIDDEN,                   # mul, +b1, *w2, +acc per term
        transcendentals=n_pad * HIDDEN,             # tanh
        bytes_accessed=2 * 4 * n_pad + 4 * N_PARAMS,
    )

    out_2d = pl.pallas_call(
        agent_mlp_kernel,
        out_shape=jax.ShapeDtypeStruct((rows, LANES), jnp.float32),
        in_specs=[
            pl.BlockSpec(memory_space=pltpu.MemorySpace.SMEM),   # packed params
            pl.BlockSpec(memory_space=pltpu.MemorySpace.VMEM),   # x (rows, 128)
        ],
        out_specs=pl.BlockSpec(memory_space=pltpu.MemorySpace.VMEM),
        cost_estimate=cost,
    )(params, x_2d)

    # Padded lanes compute garbage (w2.tanh(b1)+b2) and are sliced off here;
    # slice/reshape fuse into the same dispatch under jit.
    return out_2d.reshape(-1)[:n].reshape(n, 1)


def init_params(key):
    # Deterministic init mimicking nn.Linear's U(-1/sqrt(fan_in), 1/sqrt(fan_in)).
    k1, k2, k3, k4 = jax.random.split(key, 4)
    bound1 = 1.0 / jnp.sqrt(1.0)    # fan_in = 1
    bound2 = 1.0 / jnp.sqrt(10.0)   # fan_in = 10
    w1 = jax.random.uniform(k1, (1, HIDDEN), jnp.float32, -bound1, bound1)
    b1 = jax.random.uniform(k2, (1, HIDDEN), jnp.float32, -bound1, bound1)
    w2 = jax.random.uniform(k3, (HIDDEN, 1), jnp.float32, -bound2, bound2)
    b2 = jax.random.uniform(k4, (1, 1), jnp.float32, -bound2, bound2)
    return w1, b1, w2, b2


if __name__ == "__main__":
    key = jax.random.PRNGKey(0)
    kx, kp = jax.random.split(key)

    # Module implies x.reshape(300, 1)
    x = jax.random.normal(kx, (300, 1), jnp.float32)
    w1, b1, w2, b2 = init_params(kp)
    params = pack_params(w1, b1, w2, b2)   # packed once, outside the hot path

    out = agent_forward(x, params)
    out = jax.block_until_ready(out)

    # Pure-JAX reference check
    ref = jnp.tanh(x @ w1 + b1) @ w2 + b2
    assert out.shape == (300, 1)
    assert jnp.allclose(out, ref, atol=1e-5, rtol=1e-5)

    print("KERNEL_OK")
</pallas_src>

<mosaic_0001>
module attributes {stable_mosaic.version = 11 : i64} {
  func.func @agent_mlp_kernel(%arg0: memref<31xf32, #tpu.memory_space<smem>>, %arg1: memref<8x128xf32, #tpu.memory_space<vmem>>, %arg2: memref<8x128xf32, #tpu.memory_space<vmem>>) attributes {dimension_semantics = [], scalar_prefetch = 0 : i64, scratch_operands = 0 : i64, tpu.core_type = #tpu.core_type<tc>} {
    %c0 = arith.constant 0 : index
    %c0_0 = arith.constant 0 : index
    %0 = vector.load %arg1[%c0, %c0_0] : memref<8x128xf32, #tpu.memory_space<vmem>>, vector<8x128xf32>
    %c20 = arith.constant 20 : index
    %1 = memref.load %arg0[%c20] : memref<31xf32, #tpu.memory_space<smem>>
    %c0_1 = arith.constant 0 : index
    %2 = memref.load %arg0[%c0_1] : memref<31xf32, #tpu.memory_space<smem>>
    %3 = vector.broadcast %2 : f32 to vector<8x128xf32>
    %4 = arith.mulf %3, %0 : vector<8x128xf32>
    %c10 = arith.constant 10 : index
    %5 = memref.load %arg0[%c10] : memref<31xf32, #tpu.memory_space<smem>>
    %6 = vector.broadcast %5 : f32 to vector<8x128xf32>
    %7 = arith.addf %4, %6 : vector<8x128xf32>
    %8 = math.tanh %7 : vector<8x128xf32>
    %9 = vector.broadcast %1 : f32 to vector<8x128xf32>
    %10 = arith.mulf %9, %8 : vector<8x128xf32>
    %c21 = arith.constant 21 : index
    %11 = memref.load %arg0[%c21] : memref<31xf32, #tpu.memory_space<smem>>
    %c1 = arith.constant 1 : index
    %12 = memref.load %arg0[%c1] : memref<31xf32, #tpu.memory_space<smem>>
    %13 = vector.broadcast %12 : f32 to vector<8x128xf32>
    %14 = arith.mulf %13, %0 : vector<8x128xf32>
    %c11 = arith.constant 11 : index
    %15 = memref.load %arg0[%c11] : memref<31xf32, #tpu.memory_space<smem>>
    %16 = vector.broadcast %15 : f32 to vector<8x128xf32>
    %17 = arith.addf %14, %16 : vector<8x128xf32>
    %18 = math.tanh %17 : vector<8x128xf32>
    %19 = vector.broadcast %11 : f32 to vector<8x128xf32>
    %20 = arith.mulf %19, %18 : vector<8x128xf32>
    %c22 = arith.constant 22 : index
    %21 = memref.load %arg0[%c22] : memref<31xf32, #tpu.memory_space<smem>>
    %c2 = arith.constant 2 : index
    %22 = memref.load %arg0[%c2] : memref<31xf32, #tpu.memory_space<smem>>
    %23 = vector.broadcast %22 : f32 to vector<8x128xf32>
    %24 = arith.mulf %23, %0 : vector<8x128xf32>
    %c12 = arith.constant 12 : index
    %25 = memref.load %arg0[%c12] : memref<31xf32, #tpu.memory_space<smem>>
    %26 = vector.broadcast %25 : f32 to vector<8x128xf32>
    %27 = arith.addf %24, %26 : vector<8x128xf32>
    %28 = math.tanh %27 : vector<8x128xf32>
    %29 = vector.broadcast %21 : f32 to vector<8x128xf32>
    %30 = arith.mulf %29, %28 : vector<8x128xf32>
    %c23 = arith.constant 23 : index
    %31 = memref.load %arg0[%c23] : memref<31xf32, #tpu.memory_space<smem>>
    %c3 = arith.constant 3 : index
    %32 = memref.load %arg0[%c3] : memref<31xf32, #tpu.memory_space<smem>>
    %33 = vector.broadcast %32 : f32 to vector<8x128xf32>
    %34 = arith.mulf %33, %0 : vector<8x128xf32>
    %c13 = arith.constant 13 : index
    %35 = memref.load %arg0[%c13] : memref<31xf32, #tpu.memory_space<smem>>
    %36 = vector.broadcast %35 : f32 to vector<8x128xf32>
    %37 = arith.addf %34, %36 : vector<8x128xf32>
    %38 = math.tanh %37 : vector<8x128xf32>
    %39 = vector.broadcast %31 : f32 to vector<8x128xf32>
    %40 = arith.mulf %39, %38 : vector<8x128xf32>
    %c24 = arith.constant 24 : index
    %41 = memref.load %arg0[%c24] : memref<31xf32, #tpu.memory_space<smem>>
    %c4 = arith.constant 4 : index
    %42 = memref.load %arg0[%c4] : memref<31xf32, #tpu.memory_space<smem>>
    %43 = vector.broadcast %42 : f32 to vector<8x128xf32>
    %44 = arith.mulf %43, %0 : vector<8x128xf32>
    %c14 = arith.constant 14 : index
    %45 = memref.load %arg0[%c14] : memref<31xf32, #tpu.memory_space<smem>>
    %46 = vector.broadcast %45 : f32 to vector<8x128xf32>
    %47 = arith.addf %44, %46 : vector<8x128xf32>
    %48 = math.tanh %47 : vector<8x128xf32>
    %49 = vector.broadcast %41 : f32 to vector<8x128xf32>
    %50 = arith.mulf %49, %48 : vector<8x128xf32>
    %c25 = arith.constant 25 : index
    %51 = memref.load %arg0[%c25] : memref<31xf32, #tpu.memory_space<smem>>
    %c5 = arith.constant 5 : index
    %52 = memref.load %arg0[%c5] : memref<31xf32, #tpu.memory_space<smem>>
    %53 = vector.broadcast %52 : f32 to vector<8x128xf32>
    %54 = arith.mulf %53, %0 : vector<8x128xf32>
    %c15 = arith.constant 15 : index
    %55 = memref.load %arg0[%c15] : memref<31xf32, #tpu.memory_space<smem>>
    %56 = vector.broadcast %55 : f32 to vector<8x128xf32>
    %57 = arith.addf %54, %56 : vector<8x128xf32>
    %58 = math.tanh %57 : vector<8x128xf32>
    %59 = vector.broadcast %51 : f32 to vector<8x128xf32>
    %60 = arith.mulf %59, %58 : vector<8x128xf32>
    %c26 = arith.constant 26 : index
    %61 = memref.load %arg0[%c26] : memref<31xf32, #tpu.memory_space<smem>>
    %c6 = arith.constant 6 : index
    %62 = memref.load %arg0[%c6] : memref<31xf32, #tpu.memory_space<smem>>
    %63 = vector.broadcast %62 : f32 to vector<8x128xf32>
    %64 = arith.mulf %63, %0 : vector<8x128xf32>
    %c16 = arith.constant 16 : index
    %65 = memref.load %arg0[%c16] : memref<31xf32, #tpu.memory_space<smem>>
    %66 = vector.broadcast %65 : f32 to vector<8x128xf32>
    %67 = arith.addf %64, %66 : vector<8x128xf32>
    %68 = math.tanh %67 : vector<8x128xf32>
    %69 = vector.broadcast %61 : f32 to vector<8x128xf32>
    %70 = arith.mulf %69, %68 : vector<8x128xf32>
    %c27 = arith.constant 27 : index
    %71 = memref.load %arg0[%c27] : memref<31xf32, #tpu.memory_space<smem>>
    %c7 = arith.constant 7 : index
    %72 = memref.load %arg0[%c7] : memref<31xf32, #tpu.memory_space<smem>>
    %73 = vector.broadcast %72 : f32 to vector<8x128xf32>
    %74 = arith.mulf %73, %0 : vector<8x128xf32>
    %c17 = arith.constant 17 : index
    %75 = memref.load %arg0[%c17] : memref<31xf32, #tpu.memory_space<smem>>
    %76 = vector.broadcast %75 : f32 to vector<8x128xf32>
    %77 = arith.addf %74, %76 : vector<8x128xf32>
    %78 = math.tanh %77 : vector<8x128xf32>
    %79 = vector.broadcast %71 : f32 to vector<8x128xf32>
    %80 = arith.mulf %79, %78 : vector<8x128xf32>
    %c28 = arith.constant 28 : index
    %81 = memref.load %arg0[%c28] : memref<31xf32, #tpu.memory_space<smem>>
    %c8 = arith.constant 8 : index
    %82 = memref.load %arg0[%c8] : memref<31xf32, #tpu.memory_space<smem>>
    %83 = vector.broadcast %82 : f32 to vector<8x128xf32>
    %84 = arith.mulf %83, %0 : vector<8x128xf32>
    %c18 = arith.constant 18 : index
    %85 = memref.load %arg0[%c18] : memref<31xf32, #tpu.memory_space<smem>>
    %86 = vector.broadcast %85 : f32 to vector<8x128xf32>
    %87 = arith.addf %84, %86 : vector<8x128xf32>
    %88 = math.tanh %87 : vector<8x128xf32>
    %89 = vector.broadcast %81 : f32 to vector<8x128xf32>
    %90 = arith.mulf %89, %88 : vector<8x128xf32>
    %c29 = arith.constant 29 : index
    %91 = memref.load %arg0[%c29] : memref<31xf32, #tpu.memory_space<smem>>
    %c9 = arith.constant 9 : index
    %92 = memref.load %arg0[%c9] : memref<31xf32, #tpu.memory_space<smem>>
    %93 = vector.broadcast %92 : f32 to vector<8x128xf32>
    %94 = arith.mulf %93, %0 : vector<8x128xf32>
    %c19 = arith.constant 19 : index
    %95 = memref.load %arg0[%c19] : memref<31xf32, #tpu.memory_space<smem>>
    %96 = vector.broadcast %95 : f32 to vector<8x128xf32>
    %97 = arith.addf %94, %96 : vector<8x128xf32>
    %98 = math.tanh %97 : vector<8x128xf32>
    %99 = vector.broadcast %91 : f32 to vector<8x128xf32>
    %100 = arith.mulf %99, %98 : vector<8x128xf32>
    %101 = arith.addf %10, %20 : vector<8x128xf32>
    %102 = arith.addf %30, %40 : vector<8x128xf32>
    %103 = arith.addf %50, %60 : vector<8x128xf32>
    %104 = arith.addf %70, %80 : vector<8x128xf32>
    %105 = arith.addf %90, %100 : vector<8x128xf32>
    %106 = arith.addf %101, %102 : vector<8x128xf32>
    %107 = arith.addf %103, %104 : vector<8x128xf32>
    %108 = arith.addf %106, %107 : vector<8x128xf32>
    %109 = arith.addf %108, %105 : vector<8x128xf32>
    %c30 = arith.constant 30 : index
    %110 = memref.load %arg0[%c30] : memref<31xf32, #tpu.memory_space<smem>>
    %111 = vector.broadcast %110 : f32 to vector<8x128xf32>
    %112 = arith.addf %109, %111 : vector<8x128xf32>
    %c0_2 = arith.constant 0 : index
    %c0_3 = arith.constant 0 : index
    %113 = vector.load %arg2[%c0_2, %c0_3] : memref<8x128xf32, #tpu.memory_space<vmem>>, vector<8x128xf32>
    tpu.vector_store %arg2[%c0_2, %c0_3], %112 {strides = array<i32>} : memref<8x128xf32, #tpu.memory_space<vmem>>, vector<8x128xf32>,
    return
  }
}

</mosaic_0001>

<bundles_post_ra>
// kernel: agent_forward.1
= control target key start
LH: loop header
LB: loop body
LE: loop exit
PB: predicated region body
PF: predicated region fallthrough
CT: control target
= control target key end

     0   :  { %7 = vsyncpa [#allocation3], 0  ;;  %s305_s0 = inlined_call_operand.vmem [shape: f32[31], index: 0, kind: input, shape index: {}]   ;;  %s306_s1 = inlined_call_operand.vmem [shape: f32[8,128], index: 1, kind: input, shape index: {}]   ;;  %s307_s2 = inlined_call_operand.vmem [shape: f32[8,128], index: 2, kind: output, shape index: {}]  }
   0x1   :  { %s14_s11 = sshll.u32 %s305_s0, 4  ;;  %s15_s11 = int_to_ptr.vmem [resolvable:$true] %s14_s11 }
   0x2   :  { %s194_s12 = scalar_lea.vmem %s15_s11, 16  ;;  %p199_p1 = scmp.lt.s32.totalorder %s15_s11, %s15_s11 }
   0x3   :  { %p195_p0 = scmp.ne.s32.totalorder %s15_s11, %s194_s12  ;;  %p200_p2 = scmp.lt.s32.totalorder %s194_s12, %s194_s12 }
   0x5   :  { %p201_p3 = por %p200_p2, %p199_p1 }
   0x7   :  { %p202_p4 = pnand %p201_p3, %p195_p0 }
   0x9   :  { %205 = shalt.err (!%p202_p4)
}
   0xa   :  { %s208_s13 = smov [#allocation2]  }
   0xb   :  { %17 = dma.vmem_to_smem %s15_s11, 16, %s208_s13, [#allocation3]  }
   0xc   :  { %206 = dma.done.wait [#allocation3], 16  }
   0xd   :  { %207 = vsyncadd [#allocation3], 4294967280 }
   0xe   :  { %23 = sfence }
   0xf   :  { %s26_s14 = sld [smem:[#allocation2]]  ;;  %s144_s15 = sld [smem:[#allocation2 + $0xa]]  ;;  %v230_v0 = vld [vmem:[%s306_s1] sm:$0xff] }
  0x10   :  { %s146_s16 = sld [smem:[#allocation2 + $0x1]]  ;;  %s147_s17 = sld [smem:[#allocation2 + $0xb]] }
  0x11   :  { %s149_s18 = sld [smem:[#allocation2 + $0x2]]  ;;  %s150_s20 = sld [smem:[#allocation2 + $0xc]] }
  0x12   :  { %s152_s21 = sld [smem:[#allocation2 + $0x3]]  ;;  %s232_s22 = sld [smem:[#allocation2 + $0xd]] }
  0x13   :  { %s155_s23 = sld [smem:[#allocation2 + $0x4]]  ;;  %s235_s24 = sld [smem:[#allocation2 + $0xe]] }
  0x14   :  { %s237_s25 = sld [smem:[#allocation2 + $0x5]]  ;;  %s239_s26 = sld [smem:[#allocation2 + $0xf]] }
  0x15   :  { %v27_v1 = vstv %s26_s14  ;;  %v30_v3 = vstv %s144_s15  ;;  %s242_s1 = sld [smem:[#allocation2 + $0x6]]  ;;  %s245_s27 = sld [smem:[#allocation2 + $0x10]] }
  0x16   :  { %v28_v2 = vmul.f32 %v27_v1, %v230_v0  ;;  %v37_v4 = vstv %s146_s16  ;;  %v40_v5 = vstv %s147_s17  ;;  %s248_s28 = sld [smem:[#allocation2 + $0x7]]  ;;  %s250_s29 = sld [smem:[#allocation2 + $0x11]] }
  0x17   :  { %v38_v7 = vmul.f32 %v37_v4, %v230_v0  ;;  %v47_v8 = vstv %s149_s18  ;;  %v50_v10 = vstv %s150_s20  ;;  %s253_s30 = sld [smem:[#allocation2 + $0x8]]  ;;  %s257_s3 = sld [smem:[#allocation2 + $0x12]] }
  0x18   :  { %v31_v6 = vadd.f32 %v30_v3, %v28_v2  ;;  %v48_v9 = vmul.f32 %v47_v8, %v230_v0  ;;  %v57_v12 = vstv %s152_s21  ;;  %v60_v13 = vstv %s232_s22  ;;  %s170_s4 = sld [smem:[#allocation2 + $0x9]]  ;;  %s261_s5 = sld [smem:[#allocation2 + $0x13]] }
  0x19   :  { %v41_v11 = vadd.f32 %v40_v5, %v38_v7  ;;  %v58_v15 = vmul.f32 %v57_v12, %v230_v0  ;;  %v67_v16 = vstv %s155_s23  ;;  %v70_v18 = vstv %s235_s24  ;;  %s263_s6 = sld [smem:[#allocation2 + $0x14]]  ;;  %s265_s7 = sld [smem:[#allocation2 + $0x15]] }
  0x1a   :  { %174 = vtanh.f32 %v31_v6  ;;  %v51_v14 = vadd.f32 %v50_v10, %v48_v9  ;;  %v68_v17 = vmul.f32 %v67_v16, %v230_v0  ;;  %v77_v20 = vstv %s237_s25  ;;  %s269_s8 = sld [smem:[#allocation2 + $0x16]]  ;;  %s271_s9 = sld [smem:[#allocation2 + $0x17]] }
  0x1b   :  { %176 = vtanh.f32 %v41_v11  ;;  %v61_v19 = vadd.f32 %v60_v13, %v58_v15  ;;  %v80_v21 = vstv %s239_s26  ;;  %v78_v23 = vmul.f32 %v77_v20, %v230_v0  ;;  %s277_s10 = sld [smem:[#allocation2 + $0x18]]  ;;  %s279_s11 = sld [smem:[#allocation2 + $0x19]] }
  0x1c   :  { %178 = vtanh.f32 %v51_v14  ;;  %v71_v22 = vadd.f32 %v70_v18, %v68_v17  ;;  %v87_v24 = vstv %s242_s1  ;;  %v90_v26 = vstv %s245_s27  ;;  %s285_s12 = sld [smem:[#allocation2 + $0x1a]]  ;;  %s289_s13 = sld [smem:[#allocation2 + $0x1b]] }
  0x1d   :  { %180 = vtanh.f32 %v61_v19  ;;  %v88_v25 = vmul.f32 %v87_v24, %v230_v0  ;;  %v81_v27 = vadd.f32 %v80_v21, %v78_v23  ;;  %v97_v28 = vstv %s248_s28  ;;  %s291_s14 = sld [smem:[#allocation2 + $0x1c]]  ;;  %s169_s15 = sld [smem:[#allocation2 + $0x1d]] }
  0x1e   :  { %182 = vtanh.f32 %v71_v22  ;;  %v100_v29 = vstv %s250_s29  ;;  %v98_v31 = vmul.f32 %v97_v28, %v230_v0  ;;  %v107_v32 = vstv %s253_s30  ;;  %s172_s16 = sld [smem:[#allocation2 + $0x1e]] }
  0x1f   :  { %v91_v30 = vadd.f32 %v90_v26, %v88_v25  ;;  %184 = vtanh.f32 %v81_v27  ;;  %v108_v33 = vmul.f32 %v107_v32, %v230_v0  ;;  %v110_v34 = vstv %s257_s3 }
  0x20   :  { %v101_v35 = vadd.f32 %v100_v29, %v98_v31  ;;  %v117_v36 = vstv %s170_s4  ;;  %v120_v37 = vstv %s261_s5  ;;  %v33_v44 = vstv %s263_s6 }
  0x21   :  { %186 = vtanh.f32 %v91_v30  ;;  %v111_v38 = vadd.f32 %v110_v34, %v108_v33  ;;  %v118_v39 = vmul.f32 %v117_v36, %v230_v0  ;;  %v43_v45 = vstv %s265_s7 }
  0x22   :  { %188 = vtanh.f32 %v101_v35  ;;  %v53_v46 = vstv %s269_s8  ;;  %v63_v47 = vstv %s271_s9  ;;  %v73_v49 = vstv %s277_s10 }
  0x23   :  { %190 = vtanh.f32 %v111_v38  ;;  %v121_v42 = vadd.f32 %v120_v37, %v118_v39  ;;  %v83_v50 = vstv %s279_s11  ;;  %v93_v56 = vstv %s285_s12 }
  0x24   :  { %v175_v40 = vpop.eup %174  ;;  %v103_v61 = vstv %s289_s13  ;;  %v113_v63 = vstv %s291_s14  ;;  %v123_v5 = vstv %s169_s15  ;;  %v135_v15 = vstv %s172_s16 }
  0x25   :  { %v177_v41 = vpop.eup %176  ;;  %192 = vtanh.f32 %v121_v42  ;;  %v34_v52 = vmul.f32 %v175_v40, %v33_v44 }
  0x26   :  { %v179_v43 = vpop.eup %178  ;;  %v44_v53 = vmul.f32 %v177_v41, %v43_v45 }
  0x27   :  { %v181_v48 = vpop.eup %180  ;;  %v54_v54 = vmul.f32 %v179_v43, %v53_v46 }
  0x28   :  { %v183_v51 = vpop.eup %182  ;;  %v64_v55 = vmul.f32 %v181_v48, %v63_v47  ;;  %v125_v0 = vadd.f32 %v44_v53, %v34_v52 }
  0x29   :  { %v185_v57 = vpop.eup %184  ;;  %v74_v58 = vmul.f32 %v183_v51, %v73_v49 }
  0x2a   :  { %v84_v60 = vmul.f32 %v185_v57, %v83_v50  ;;  %v126_v1 = vadd.f32 %v64_v55, %v54_v54 }
  0x2b   :  { %v187_v59 = vpop.eup %186 }
  0x2c   :  { %v94_v62 = vmul.f32 %v187_v59, %v93_v56  ;;  %v189_v2 = vpop.eup %188  ;;  %v127_v6 = vadd.f32 %v84_v60, %v74_v58  ;;  %v130_v10 = vadd.f32 %v126_v1, %v125_v0 }
  0x2d   :  { %v191_v3 = vpop.eup %190  ;;  %v104_v4 = vmul.f32 %v189_v2, %v103_v61 }
  0x2e   :  { %v114_v7 = vmul.f32 %v191_v3, %v113_v63 }
  0x2f   :  { %v193_v8 = vpop.eup %192  ;;  %v128_v9 = vadd.f32 %v104_v4, %v94_v62 }
  0x30   :  { %v124_v11 = vmul.f32 %v193_v8, %v123_v5 }
  0x31   :  { %v131_v12 = vadd.f32 %v128_v9, %v127_v6 }
  0x32   :  { %v129_v13 = vadd.f32 %v124_v11, %v114_v7 }
  0x33   :  { %v132_v14 = vadd.f32 %v131_v12, %v130_v10 }
  0x35   :  { %v133_v16 = vadd.f32 %v132_v14, %v129_v13 }
  0x37   :  { %v136_v17 = vadd.f32 %v135_v15, %v133_v16 }
  0x39   :  { %137 = vst [vmem:[%s307_s2] sm:$0xff] %v136_v17 }
  0x3a   :  { %142 = vsyncpa [#allocation3], 1 }

</bundles_post_ra>
